<compile_context>
chip_gen: v7x
topology: tpu7x:2x2x1
jax: 0.10.0
libtpu: 0.0.40
codegen_flags: <defaults>
</compile_context>

<pallas_src>
import functools

import jax
import jax.numpy as jnp
from jax.experimental import pallas as pl
from jax.experimental.pallas import tpu as pltpu


def _round_up(x, m):
    return ((x + m - 1) // m) * m


def _mapping_kernel(n_shared, n_unshared_hidden, n_domains,
                    rows_ref, counts_ref,                  # SMEM scalar prefetch
                    z_ref, y_ref,
                    in_w_ref, in_b_ref, sh_w_ref, sh_b_ref,
                    un_w_ref, un_b_ref, out_w_ref, out_b_ref,
                    o_ref,
                    h_ref):                                # VMEM scratch (TB, Hp) bf16
    i = pl.program_id(0)
    bf16 = jnp.bfloat16

    # Zero-init: required so padded rows / never-written rows don't expose stale VMEM.
    o_ref[...] = jnp.zeros_like(o_ref)

    # ---- shared trunk: skipped entirely for all-padding batch tiles ----
    @pl.when(rows_ref[i] > 0)
    def _():
        h = jnp.dot(z_ref[...], in_w_ref[...], preferred_element_type=jnp.float32)
        h = jnp.maximum(h + in_b_ref[...], 0.0)
        for s in range(n_shared):                          # static unroll
            h = jnp.dot(h.astype(bf16), sh_w_ref[s],
                        preferred_element_type=jnp.float32)
            h = jnp.maximum(h + sh_b_ref[s], 0.0)
        h_ref[...] = h.astype(bf16)

    # ---- per-domain heads: all weights VMEM-resident; empty domains are skipped ----
    for d in range(n_domains):                             # static unroll (small D)
        @pl.when(counts_ref[i * n_domains + d] > 0)
        def _(d=d):
            hd = h_ref[...]                                # bf16 trunk features
            for u in range(n_unshared_hidden):             # static unroll
                t = jnp.dot(hd, un_w_ref[d, u], preferred_element_type=jnp.float32)
                hd = jnp.maximum(t + un_b_ref[d, u], 0.0).astype(bf16)
            style = (jnp.dot(hd, out_w_ref[d], preferred_element_type=jnp.float32)
                     + out_b_ref[d])
            mask = y_ref[...] == d                         # (TB, 1) bool
            o_ref[...] = jnp.where(mask, style, o_ref[...])


def mapping_network_forward(z, y, params):
    B, L = z.shape
    in_w, in_b = params["in_w"], params["in_b"]
    sh_w, sh_b = params["sh_w"], params["sh_b"]
    un_w, un_b = params["un_w"], params["un_b"]
    out_w, out_b = params["out_w"], params["out_b"]

    H = in_w.shape[1]
    D = out_w.shape[0]
    U1 = un_w.shape[1]          # number of hidden unshared layers (= unshared_size - 1)
    S = sh_w.shape[0]
    E = out_w.shape[2]

    # ---- lane/sublane-aligned padded shapes ----
    Lp = _round_up(L, 128)
    Hp = _round_up(H, 128)
    Ep = _round_up(E, 128)
    if B <= 128:
        TB = _round_up(B, 8)
        Bp = TB
    elif B < 256:
        TB = 128
        Bp = _round_up(B, 128)
    else:
        TB = 256                 # feed the 2x256x256 MXU on v6e/v7x, fewer grid steps
        Bp = _round_up(B, 256)
    n_tiles = Bp // TB

    f32, bf16 = jnp.float32, jnp.bfloat16

    def zpad(a, shape, dtype):
        return jnp.pad(a.astype(dtype), [(0, t - s) for s, t in zip(a.shape, shape)])

    # matmul operands in bf16; biases stay f32 (elementwise add/ReLU on the VPU)
    z_p = zpad(z, (Bp, Lp), bf16)
    in_w_p = zpad(in_w, (Lp, Hp), bf16)
    in_b_p = zpad(in_b, (1, Hp), f32)

    if S > 0:
        sh_w_p = zpad(sh_w, (S, Hp, Hp), bf16)
        sh_b_p = zpad(sh_b, (S, 1, Hp), f32)
    else:  # tiny dummies; the static loop count (S) keeps the kernel from reading them
        sh_w_p = jnp.zeros((1, 16, 128), bf16)
        sh_b_p = jnp.zeros((1, 1, 128), f32)

    if U1 > 0:
        un_w_p = zpad(un_w, (D, U1, Hp, Hp), bf16)
        un_b_p = zpad(un_b, (D, U1, 1, Hp), f32)
    else:  # shrunken dummies — never DMA'd in bulk, never read by the kernel
        un_w_p = jnp.zeros((1, 1, 16, 128), bf16)
        un_b_p = jnp.zeros((1, 1, 1, 128), f32)

    out_w_p = zpad(out_w, (D, Hp, Ep), bf16)
    out_b_p = zpad(out_b, (D, 1, Ep), f32)

    # labels: pad with -1 (never matches a domain); per-tile / per-(tile,domain) counts
    y_i = y.astype(jnp.int32)
    y_pad = jnp.concatenate([y_i, jnp.full((Bp - B,), -1, jnp.int32)])
    y2d = y_pad.reshape(Bp, 1)
    per_dom = jnp.sum(
        y_pad.reshape(n_tiles, TB, 1) == jnp.arange(D, dtype=jnp.int32)[None, None, :],
        axis=1).astype(jnp.int32)                          # (n_tiles, D)
    counts = per_dom.reshape(-1)                           # flat, SMEM-friendly 1-D
    rows = jnp.sum(per_dom, axis=1).astype(jnp.int32)      # real rows per tile

    kernel = functools.partial(_mapping_kernel, S, U1, D)

    # VMEM footprint estimate (resident weights are double-buffered by the default
    # pipeline; that slack is acceptable at these sizes).  Explicit limit matters on
    # v7x (64 MiB physical / 32 MiB scoped default).
    def nbytes(a):
        return a.size * a.dtype.itemsize
    weight_bytes = sum(map(nbytes, (in_w_p, in_b_p, sh_w_p, sh_b_p,
                                    un_w_p, un_b_p, out_w_p, out_b_p)))
    stream_bytes = TB * Lp * 2 + TB * 4 + TB * Ep * 4      # z, y, out blocks
    scratch_bytes = TB * Hp * 2
    vmem_est = 2 * (weight_bytes + stream_bytes) + scratch_bytes
    vmem_limit = int(min(128 * 1024 * 1024, max(4 * vmem_est, 32 * 1024 * 1024)))

    out = pl.pallas_call(
        kernel,
        out_shape=jax.ShapeDtypeStruct((Bp, Ep), f32),
        grid_spec=pltpu.PrefetchScalarGridSpec(
            num_scalar_prefetch=2,
            grid=(n_tiles,),
            in_specs=[
                pl.BlockSpec((TB, Lp), lambda i, r, c: (i, 0)),        # z tile
                pl.BlockSpec((TB, 1), lambda i, r, c: (i, 0)),         # labels
                pl.BlockSpec(in_w_p.shape, lambda i, r, c: (0, 0)),    # in_w (resident)
                pl.BlockSpec(in_b_p.shape, lambda i, r, c: (0, 0)),    # in_b
                pl.BlockSpec(sh_w_p.shape, lambda i, r, c: (0, 0, 0)),     # shared W
                pl.BlockSpec(sh_b_p.shape, lambda i, r, c: (0, 0, 0)),     # shared b
                pl.BlockSpec(un_w_p.shape, lambda i, r, c: (0, 0, 0, 0)),  # unshared W (all D)
                pl.BlockSpec(un_b_p.shape, lambda i, r, c: (0, 0, 0, 0)),  # unshared b (all D)
                pl.BlockSpec(out_w_p.shape, lambda i, r, c: (0, 0, 0)),    # final W (all D)
                pl.BlockSpec(out_b_p.shape, lambda i, r, c: (0, 0, 0)),    # final b (all D)
            ],
            out_specs=pl.BlockSpec((TB, Ep), lambda i, r, c: (i, 0)),  # lane-dense out
            scratch_shapes=[pltpu.VMEM((TB, Hp), bf16)],               # trunk features
        ),
        compiler_params=pltpu.CompilerParams(
            dimension_semantics=("parallel",),
            vmem_limit_bytes=vmem_limit),
    )(rows, counts, z_p, y2d, in_w_p, in_b_p, sh_w_p, sh_b_p,
      un_w_p, un_b_p, out_w_p, out_b_p)

    return out[:B, :E]


def init_params(key, latent_dim, hidden_dim, embedding_dim,
                shared_size, unshared_size, domains):
    # Deterministic synthetic init (the original uses init_fc_zero; zero weights
    # would make the forward trivially zero, so small random values are used).
    ks = jax.random.split(key, 8)
    s = 0.1
    u1 = unshared_size - 1
    return {
        "in_w": s * jax.random.normal(ks[0], (latent_dim, hidden_dim), jnp.float32),
        "in_b": s * jax.random.normal(ks[1], (1, hidden_dim), jnp.float32),
        "sh_w": s * jax.random.normal(ks[2], (shared_size, hidden_dim, hidden_dim), jnp.float32),
        "sh_b": s * jax.random.normal(ks[3], (shared_size, 1, hidden_dim), jnp.float32),
        "un_w": (s * jax.random.normal(ks[4], (domains, u1, hidden_dim, hidden_dim), jnp.float32)
                 if u1 > 0 else jnp.zeros((domains, 0, hidden_dim, hidden_dim), jnp.float32)),
        "un_b": (s * jax.random.normal(ks[5], (domains, u1, 1, hidden_dim), jnp.float32)
                 if u1 > 0 else jnp.zeros((domains, 0, 1, hidden_dim), jnp.float32)),
        "out_w": s * jax.random.normal(ks[6], (domains, hidden_dim, embedding_dim), jnp.float32),
        "out_b": s * jax.random.normal(ks[7], (domains, 1, embedding_dim), jnp.float32),
    }


def mapping_network_reference(z, y, p):
    # Pure-JAX reference mirroring the PyTorch forward, with the same bf16 matmul
    # operands / f32 accumulation as the kernel so the comparison is tight.
    bf16 = jnp.bfloat16

    def mm(a, w):
        return jnp.dot(a.astype(bf16), w.astype(bf16),
                       preferred_element_type=jnp.float32)

    h = jax.nn.relu(mm(z, p["in_w"]) + p["in_b"])
    for s in range(p["sh_w"].shape[0]):
        h = jax.nn.relu(mm(h, p["sh_w"][s]) + p["sh_b"][s])
    styles = []
    for d in range(p["out_w"].shape[0]):
        hd = h
        for u in range(p["un_w"].shape[1]):
            hd = jax.nn.relu(mm(hd, p["un_w"][d, u]) + p["un_b"][d, u])
        styles.append(mm(hd, p["out_w"][d]) + p["out_b"][d])
    styles = jnp.stack(styles, axis=1)                     # (B, D, E)
    return styles[jnp.arange(z.shape[0]), y]


if __name__ == "__main__":
    latent_dim, hidden_dim, embedding_dim = 16, 32, 16
    shared_size, unshared_size, domains = 2, 2, 3
    B = 4

    key = jax.random.PRNGKey(0)
    kz, ky, kp = jax.random.split(key, 3)
    z = jax.random.normal(kz, (B, latent_dim), jnp.float32)
    y = jax.random.randint(ky, (B,), 0, domains, dtype=jnp.int32)
    params = init_params(kp, latent_dim, hidden_dim, embedding_dim,
                         shared_size, unshared_size, domains)

    out = jax.block_until_ready(mapping_network_forward(z, y, params))
    ref = mapping_network_reference(z, y, params)

    assert out.shape == (B, embedding_dim), out.shape
    assert jnp.allclose(out, ref, atol=2e-3, rtol=2e-3), "mismatch vs reference"
    print("KERNEL_OK")
</pallas_src>

<mosaic_0001>
module attributes {stable_mosaic.version = 11 : i64} {
  func.func @_mapping_kernel(%arg0: i32, %arg1: memref<1xi32, #tpu.memory_space<smem>>, %arg2: memref<3xi32, #tpu.memory_space<smem>>, %arg3: memref<8x128xbf16, #tpu.memory_space<vmem>>, %arg4: memref<8x1xi32, #tpu.memory_space<vmem>>, %arg5: memref<128x128xbf16, #tpu.memory_space<vmem>>, %arg6: memref<1x128xf32, #tpu.memory_space<vmem>>, %arg7: memref<2x128x128xbf16, #tpu.memory_space<vmem>>, %arg8: memref<2x1x128xf32, #tpu.memory_space<vmem>>, %arg9: memref<3x1x128x128xbf16, #tpu.memory_space<vmem>>, %arg10: memref<3x1x1x128xf32, #tpu.memory_space<vmem>>, %arg11: memref<3x128x128xbf16, #tpu.memory_space<vmem>>, %arg12: memref<3x1x128xf32, #tpu.memory_space<vmem>>, %arg13: memref<8x128xf32, #tpu.memory_space<vmem>>, %arg14: memref<8x128xbf16, #tpu.memory_space<vmem>>) attributes {dimension_semantics = [#tpu.dimension_semantics<parallel>], iteration_bounds = array<i64: 1>, scalar_prefetch = 2 : i64, scratch_operands = 1 : i64, tpu.core_type = #tpu.core_type<tc>, window_params = [{transform_indices = @transform_0, window_bounds = array<i64: 8, 128>}, {transform_indices = @transform_1, window_bounds = array<i64: 8, 1>}, {pipeline_mode = #tpu.pipeline_mode<synchronous>, transform_indices = @transform_2, window_bounds = array<i64: 128, 128>}, {pipeline_mode = #tpu.pipeline_mode<synchronous>, transform_indices = @transform_3, window_bounds = array<i64: 1, 128>}, {pipeline_mode = #tpu.pipeline_mode<synchronous>, transform_indices = @transform_4, window_bounds = array<i64: 2, 128, 128>}, {pipeline_mode = #tpu.pipeline_mode<synchronous>, transform_indices = @transform_5, window_bounds = array<i64: 2, 1, 128>}, {pipeline_mode = #tpu.pipeline_mode<synchronous>, transform_indices = @transform_6, window_bounds = array<i64: 3, 1, 128, 128>}, {pipeline_mode = #tpu.pipeline_mode<synchronous>, transform_indices = @transform_7, window_bounds = array<i64: 3, 1, 1, 128>}, {pipeline_mode = #tpu.pipeline_mode<synchronous>, transform_indices = @transform_8, window_bounds = array<i64: 3, 128, 128>}, {pipeline_mode = #tpu.pipeline_mode<synchronous>, transform_indices = @transform_9, window_bounds = array<i64: 3, 1, 128>}, {transform_indices = @transform_10, window_bounds = array<i64: 8, 128>}]} {
    %cst = arith.constant 0.000000e+00 : f32
    %0 = vector.broadcast %cst : f32 to vector<8x128xf32>
    %c0 = arith.constant 0 : index
    %c0_0 = arith.constant 0 : index
    %1 = vector.load %arg13[%c0, %c0_0] : memref<8x128xf32, #tpu.memory_space<vmem>>, vector<8x128xf32>
    tpu.vector_store %arg13[%c0, %c0_0], %0 {strides = array<i32>} : memref<8x128xf32, #tpu.memory_space<vmem>>, vector<8x128xf32>,
    %2 = arith.index_cast %arg0 : i32 to index
    %3 = memref.load %arg1[%2] : memref<1xi32, #tpu.memory_space<smem>>
    %c0_i32 = arith.constant 0 : i32
    %4 = arith.cmpi sgt, %3, %c0_i32 : i32
    %5 = arith.extui %4 : i1 to i32
    %c0_i32_1 = arith.constant 0 : i32
    %6 = arith.cmpi ne, %5, %c0_i32_1 : i32
    scf.if %6 {
      %c0_11 = arith.constant 0 : index
      %c0_12 = arith.constant 0 : index
      %28 = vector.load %arg3[%c0_11, %c0_12] : memref<8x128xbf16, #tpu.memory_space<vmem>>, vector<8x128xbf16>
      %c0_13 = arith.constant 0 : index
      %c0_14 = arith.constant 0 : index
      %29 = vector.load %arg5[%c0_13, %c0_14] : memref<128x128xbf16, #tpu.memory_space<vmem>>, vector<128x128xbf16>
      %cst_15 = arith.constant dense<0.000000e+00> : vector<8x128xf32>
      %30 = tpu.matmul %28, %29, %cst_15 {dimension_numbers = #tpu.dot_dimension_numbers<[1], [0], [0], [1], [0, 0, 1, 1], [], []>} : vector<8x128xbf16>, vector<128x128xbf16>, vector<8x128xf32> -> vector<8x128xf32>
      %c0_16 = arith.constant 0 : index
      %c0_17 = arith.constant 0 : index
      %31 = vector.load %arg6[%c0_16, %c0_17] : memref<1x128xf32, #tpu.memory_space<vmem>>, vector<1x128xf32>
      %32 = vector.broadcast %31 : vector<1x128xf32> to vector<8x128xf32>
      %33 = arith.addf %30, %32 : vector<8x128xf32>
      %cst_18 = arith.constant 0.000000e+00 : f32
      %34 = vector.broadcast %cst_18 : f32 to vector<8x128xf32>
      %35 = arith.maximumf %33, %34 : vector<8x128xf32>
      %36 = arith.truncf %35 : vector<8x128xf32> to vector<8x128xbf16>
      %c0_19 = arith.constant 0 : index
      %c0_20 = arith.constant 0 : index
      %c0_21 = arith.constant 0 : index
      %37 = vector.load %arg7[%c0_19, %c0_20, %c0_21] : memref<2x128x128xbf16, #tpu.memory_space<vmem>>, vector<1x128x128xbf16>
      %38 = vector.shape_cast %37 : vector<1x128x128xbf16> to vector<128x128xbf16>
      %cst_22 = arith.constant dense<0.000000e+00> : vector<8x128xf32>
      %39 = tpu.matmul %36, %38, %cst_22 {dimension_numbers = #tpu.dot_dimension_numbers<[1], [0], [0], [1], [0, 0, 1, 1], [], []>} : vector<8x128xbf16>, vector<128x128xbf16>, vector<8x128xf32> -> vector<8x128xf32>
      %c0_23 = arith.constant 0 : index
      %c0_24 = arith.constant 0 : index
      %c0_25 = arith.constant 0 : index
      %40 = vector.load %arg8[%c0_23, %c0_24, %c0_25] : memref<2x1x128xf32, #tpu.memory_space<vmem>>, vector<1x1x128xf32>
      %41 = vector.shape_cast %40 : vector<1x1x128xf32> to vector<1x128xf32>
      %42 = vector.broadcast %41 : vector<1x128xf32> to vector<8x128xf32>
      %43 = arith.addf %39, %42 : vector<8x128xf32>
      %cst_26 = arith.constant 0.000000e+00 : f32
      %44 = vector.broadcast %cst_26 : f32 to vector<8x128xf32>
      %45 = arith.maximumf %43, %44 : vector<8x128xf32>
      %46 = arith.truncf %45 : vector<8x128xf32> to vector<8x128xbf16>
      %c1 = arith.constant 1 : index
      %c0_27 = arith.constant 0 : index
      %c0_28 = arith.constant 0 : index
      %47 = vector.load %arg7[%c1, %c0_27, %c0_28] : memref<2x128x128xbf16, #tpu.memory_space<vmem>>, vector<1x128x128xbf16>
      %48 = vector.shape_cast %47 : vector<1x128x128xbf16> to vector<128x128xbf16>
      %cst_29 = arith.constant dense<0.000000e+00> : vector<8x128xf32>
      %49 = tpu.matmul %46, %48, %cst_29 {dimension_numbers = #tpu.dot_dimension_numbers<[1], [0], [0], [1], [0, 0, 1, 1], [], []>} : vector<8x128xbf16>, vector<128x128xbf16>, vector<8x128xf32> -> vector<8x128xf32>
      %c1_30 = arith.constant 1 : index
      %c0_31 = arith.constant 0 : index
      %c0_32 = arith.constant 0 : index
      %50 = vector.load %arg8[%c1_30, %c0_31, %c0_32] : memref<2x1x128xf32, #tpu.memory_space<vmem>>, vector<1x1x128xf32>
      %51 = vector.shape_cast %50 : vector<1x1x128xf32> to vector<1x128xf32>
      %52 = vector.broadcast %51 : vector<1x128xf32> to vector<8x128xf32>
      %53 = arith.addf %49, %52 : vector<8x128xf32>
      %cst_33 = arith.constant 0.000000e+00 : f32
      %54 = vector.broadcast %cst_33 : f32 to vector<8x128xf32>
      %55 = arith.maximumf %53, %54 : vector<8x128xf32>
      %56 = arith.truncf %55 : vector<8x128xf32> to vector<8x128xbf16>
      %c0_34 = arith.constant 0 : index
      %c0_35 = arith.constant 0 : index
      %57 = vector.load %arg14[%c0_34, %c0_35] : memref<8x128xbf16, #tpu.memory_space<vmem>>, vector<8x128xbf16>
      tpu.vector_store %arg14[%c0_34, %c0_35], %56 {strides = array<i32>} : memref<8x128xbf16, #tpu.memory_space<vmem>>, vector<8x128xbf16>,
    } else {
    }
    %c3_i32 = arith.constant 3 : i32
    %7 = arith.muli %arg0, %c3_i32 : i32
    %c0_i32_2 = arith.constant 0 : i32
    %8 = arith.addi %7, %c0_i32_2 : i32
    %9 = arith.index_cast %8 : i32 to index
    %10 = memref.load %arg2[%9] : memref<3xi32, #tpu.memory_space<smem>>
    %c0_i32_3 = arith.constant 0 : i32
    %11 = arith.cmpi sgt, %10, %c0_i32_3 : i32
    %12 = arith.extui %11 : i1 to i32
    %c0_i32_4 = arith.constant 0 : i32
    %13 = arith.cmpi ne, %12, %c0_i32_4 : i32
    scf.if %13 {
      %c0_11 = arith.constant 0 : index
      %c0_12 = arith.constant 0 : index
      %28 = vector.load %arg14[%c0_11, %c0_12] : memref<8x128xbf16, #tpu.memory_space<vmem>>, vector<8x128xbf16>
      %c0_13 = arith.constant 0 : index
      %c0_14 = arith.constant 0 : index
      %c0_15 = arith.constant 0 : index
      %c0_16 = arith.constant 0 : index
      %29 = vector.load %arg9[%c0_13, %c0_14, %c0_15, %c0_16] : memref<3x1x128x128xbf16, #tpu.memory_space<vmem>>, vector<1x1x128x128xbf16>
      %30 = vector.shape_cast %29 : vector<1x1x128x128xbf16> to vector<128x128xbf16>
      %cst_17 = arith.constant dense<0.000000e+00> : vector<8x128xf32>
      %31 = tpu.matmul %28, %30, %cst_17 {dimension_numbers = #tpu.dot_dimension_numbers<[1], [0], [0], [1], [0, 0, 1, 1], [], []>} : vector<8x128xbf16>, vector<128x128xbf16>, vector<8x128xf32> -> vector<8x128xf32>
      %c0_18 = arith.constant 0 : index
      %c0_19 = arith.constant 0 : index
      %c0_20 = arith.constant 0 : index
      %c0_21 = arith.constant 0 : index
      %32 = vector.load %arg10[%c0_18, %c0_19, %c0_20, %c0_21] : memref<3x1x1x128xf32, #tpu.memory_space<vmem>>, vector<1x1x1x128xf32>
      %33 = vector.shape_cast %32 : vector<1x1x1x128xf32> to vector<1x128xf32>
      %34 = vector.broadcast %33 : vector<1x128xf32> to vector<8x128xf32>
      %35 = arith.addf %31, %34 : vector<8x128xf32>
      %cst_22 = arith.constant 0.000000e+00 : f32
      %36 = vector.broadcast %cst_22 : f32 to vector<8x128xf32>
      %37 = arith.maximumf %35, %36 : vector<8x128xf32>
      %38 = arith.truncf %37 : vector<8x128xf32> to vector<8x128xbf16>
      %c0_23 = arith.constant 0 : index
      %c0_24 = arith.constant 0 : index
      %c0_25 = arith.constant 0 : index
      %39 = vector.load %arg11[%c0_23, %c0_24, %c0_25] : memref<3x128x128xbf16, #tpu.memory_space<vmem>>, vector<1x128x128xbf16>
      %40 = vector.shape_cast %39 : vector<1x128x128xbf16> to vector<128x128xbf16>
      %cst_26 = arith.constant dense<0.000000e+00> : vector<8x128xf32>
      %41 = tpu.matmul %38, %40, %cst_26 {dimension_numbers = #tpu.dot_dimension_numbers<[1], [0], [0], [1], [0, 0, 1, 1], [], []>} : vector<8x128xbf16>, vector<128x128xbf16>, vector<8x128xf32> -> vector<8x128xf32>
      %c0_27 = arith.constant 0 : index
      %c0_28 = arith.constant 0 : index
      %c0_29 = arith.constant 0 : index
      %42 = vector.load %arg12[%c0_27, %c0_28, %c0_29] : memref<3x1x128xf32, #tpu.memory_space<vmem>>, vector<1x1x128xf32>
      %43 = vector.shape_cast %42 : vector<1x1x128xf32> to vector<1x128xf32>
      %44 = vector.broadcast %43 : vector<1x128xf32> to vector<8x128xf32>
      %45 = arith.addf %41, %44 : vector<8x128xf32>
      %c0_30 = arith.constant 0 : index
      %c0_31 = arith.constant 0 : index
      %46 = vector.load %arg4[%c0_30, %c0_31] : memref<8x1xi32, #tpu.memory_space<vmem>>, vector<8x1xi32>
      %c0_i32_32 = arith.constant 0 : i32
      %47 = vector.broadcast %c0_i32_32 : i32 to vector<8x1xi32>
      %48 = arith.cmpi eq, %46, %47 : vector<8x1xi32>
      %c0_33 = arith.constant 0 : index
      %c0_34 = arith.constant 0 : index
      %49 = vector.load %arg13[%c0_33, %c0_34] : memref<8x128xf32, #tpu.memory_space<vmem>>, vector<8x128xf32>
      %50 = vector.shape_cast %48 : vector<8x1xi1> to vector<8x1xi1>
      %51 = vector.broadcast %50 : vector<8x1xi1> to vector<8x128xi1>
      %52 = arith.select %51, %45, %49 : vector<8x128xi1>, vector<8x128xf32>
      %c0_35 = arith.constant 0 : index
      %c0_36 = arith.constant 0 : index
      %53 = vector.load %arg13[%c0_35, %c0_36] : memref<8x128xf32, #tpu.memory_space<vmem>>, vector<8x128xf32>
      tpu.vector_store %arg13[%c0_35, %c0_36], %52 {strides = array<i32>} : memref<8x128xf32, #tpu.memory_space<vmem>>, vector<8x128xf32>,
    } else {
    }
    %c3_i32_5 = arith.constant 3 : i32
    %14 = arith.muli %arg0, %c3_i32_5 : i32
    %c1_i32 = arith.constant 1 : i32
    %15 = arith.addi %14, %c1_i32 : i32
    %16 = arith.index_cast %15 : i32 to index
    %17 = memref.load %arg2[%16] : memref<3xi32, #tpu.memory_space<smem>>
    %c0_i32_6 = arith.constant 0 : i32
    %18 = arith.cmpi sgt, %17, %c0_i32_6 : i32
    %19 = arith.extui %18 : i1 to i32
    %c0_i32_7 = arith.constant 0 : i32
    %20 = arith.cmpi ne, %19, %c0_i32_7 : i32
    scf.if %20 {
      %c0_11 = arith.constant 0 : index
      %c0_12 = arith.constant 0 : index
      %28 = vector.load %arg14[%c0_11, %c0_12] : memref<8x128xbf16, #tpu.memory_space<vmem>>, vector<8x128xbf16>
      %c1 = arith.constant 1 : index
      %c0_13 = arith.constant 0 : index
      %c0_14 = arith.constant 0 : index
      %c0_15 = arith.constant 0 : index
      %29 = vector.load %arg9[%c1, %c0_13, %c0_14, %c0_15] : memref<3x1x128x128xbf16, #tpu.memory_space<vmem>>, vector<1x1x128x128xbf16>
      %30 = vector.shape_cast %29 : vector<1x1x128x128xbf16> to vector<128x128xbf16>
      %cst_16 = arith.constant dense<0.000000e+00> : vector<8x128xf32>
      %31 = tpu.matmul %28, %30, %cst_16 {dimension_numbers = #tpu.dot_dimension_numbers<[1], [0], [0], [1], [0, 0, 1, 1], [], []>} : vector<8x128xbf16>, vector<128x128xbf16>, vector<8x128xf32> -> vector<8x128xf32>
      %c1_17 = arith.constant 1 : index
      %c0_18 = arith.constant 0 : index
      %c0_19 = arith.constant 0 : index
      %c0_20 = arith.constant 0 : index
      %32 = vector.load %arg10[%c1_17, %c0_18, %c0_19, %c0_20] : memref<3x1x1x128xf32, #tpu.memory_space<vmem>>, vector<1x1x1x128xf32>
      %33 = vector.shape_cast %32 : vector<1x1x1x128xf32> to vector<1x128xf32>
      %34 = vector.broadcast %33 : vector<1x128xf32> to vector<8x128xf32>
      %35 = arith.addf %31, %34 : vector<8x128xf32>
      %cst_21 = arith.constant 0.000000e+00 : f32
      %36 = vector.broadcast %cst_21 : f32 to vector<8x128xf32>
      %37 = arith.maximumf %35, %36 : vector<8x128xf32>
      %38 = arith.truncf %37 : vector<8x128xf32> to vector<8x128xbf16>
      %c1_22 = arith.constant 1 : index
      %c0_23 = arith.constant 0 : index
      %c0_24 = arith.constant 0 : index
      %39 = vector.load %arg11[%c1_22, %c0_23, %c0_24] : memref<3x128x128xbf16, #tpu.memory_space<vmem>>, vector<1x128x128xbf16>
      %40 = vector.shape_cast %39 : vector<1x128x128xbf16> to vector<128x128xbf16>
      %cst_25 = arith.constant dense<0.000000e+00> : vector<8x128xf32>
      %41 = tpu.matmul %38, %40, %cst_25 {dimension_numbers = #tpu.dot_dimension_numbers<[1], [0], [0], [1], [0, 0, 1, 1], [], []>} : vector<8x128xbf16>, vector<128x128xbf16>, vector<8x128xf32> -> vector<8x128xf32>
      %c1_26 = arith.constant 1 : index
      %c0_27 = arith.constant 0 : index
      %c0_28 = arith.constant 0 : index
      %42 = vector.load %arg12[%c1_26, %c0_27, %c0_28] : memref<3x1x128xf32, #tpu.memory_space<vmem>>, vector<1x1x128xf32>
      %43 = vector.shape_cast %42 : vector<1x1x128xf32> to vector<1x128xf32>
      %44 = vector.broadcast %43 : vector<1x128xf32> to vector<8x128xf32>
      %45 = arith.addf %41, %44 : vector<8x128xf32>
      %c0_29 = arith.constant 0 : index
      %c0_30 = arith.constant 0 : index
      %46 = vector.load %arg4[%c0_29, %c0_30] : memref<8x1xi32, #tpu.memory_space<vmem>>, vector<8x1xi32>
      %c1_i32_31 = arith.constant 1 : i32
      %47 = vector.broadcast %c1_i32_31 : i32 to vector<8x1xi32>
      %48 = arith.cmpi eq, %46, %47 : vector<8x1xi32>
      %c0_32 = arith.constant 0 : index
      %c0_33 = arith.constant 0 : index
      %49 = vector.load %arg13[%c0_32, %c0_33] : memref<8x128xf32, #tpu.memory_space<vmem>>, vector<8x128xf32>
      %50 = vector.shape_cast %48 : vector<8x1xi1> to vector<8x1xi1>
      %51 = vector.broadcast %50 : vector<8x1xi1> to vector<8x128xi1>
      %52 = arith.select %51, %45, %49 : vector<8x128xi1>, vector<8x128xf32>
      %c0_34 = arith.constant 0 : index
      %c0_35 = arith.constant 0 : index
      %53 = vector.load %arg13[%c0_34, %c0_35] : memref<8x128xf32, #tpu.memory_space<vmem>>, vector<8x128xf32>
      tpu.vector_store %arg13[%c0_34, %c0_35], %52 {strides = array<i32>} : memref<8x128xf32, #tpu.memory_space<vmem>>, vector<8x128xf32>,
    } else {
    }
    %c3_i32_8 = arith.constant 3 : i32
    %21 = arith.muli %arg0, %c3_i32_8 : i32
    %c2_i32 = arith.constant 2 : i32
    %22 = arith.addi %21, %c2_i32 : i32
    %23 = arith.index_cast %22 : i32 to index
    %24 = memref.load %arg2[%23] : memref<3xi32, #tpu.memory_space<smem>>
    %c0_i32_9 = arith.constant 0 : i32
    %25 = arith.cmpi sgt, %24, %c0_i32_9 : i32
    %26 = arith.extui %25 : i1 to i32
    %c0_i32_10 = arith.constant 0 : i32
    %27 = arith.cmpi ne, %26, %c0_i32_10 : i32
    scf.if %27 {
      %c0_11 = arith.constant 0 : index
      %c0_12 = arith.constant 0 : index
      %28 = vector.load %arg14[%c0_11, %c0_12] : memref<8x128xbf16, #tpu.memory_space<vmem>>, vector<8x128xbf16>
      %c2 = arith.constant 2 : index
      %c0_13 = arith.constant 0 : index
      %c0_14 = arith.constant 0 : index
      %c0_15 = arith.constant 0 : index
      %29 = vector.load %arg9[%c2, %c0_13, %c0_14, %c0_15] : memref<3x1x128x128xbf16, #tpu.memory_space<vmem>>, vector<1x1x128x128xbf16>
      %30 = vector.shape_cast %29 : vector<1x1x128x128xbf16> to vector<128x128xbf16>
      %cst_16 = arith.constant dense<0.000000e+00> : vector<8x128xf32>
      %31 = tpu.matmul %28, %30, %cst_16 {dimension_numbers = #tpu.dot_dimension_numbers<[1], [0], [0], [1], [0, 0, 1, 1], [], []>} : vector<8x128xbf16>, vector<128x128xbf16>, vector<8x128xf32> -> vector<8x128xf32>
      %c2_17 = arith.constant 2 : index
      %c0_18 = arith.constant 0 : index
      %c0_19 = arith.constant 0 : index
      %c0_20 = arith.constant 0 : index
      %32 = vector.load %arg10[%c2_17, %c0_18, %c0_19, %c0_20] : memref<3x1x1x128xf32, #tpu.memory_space<vmem>>, vector<1x1x1x128xf32>
      %33 = vector.shape_cast %32 : vector<1x1x1x128xf32> to vector<1x128xf32>
      %34 = vector.broadcast %33 : vector<1x128xf32> to vector<8x128xf32>
      %35 = arith.addf %31, %34 : vector<8x128xf32>
      %cst_21 = arith.constant 0.000000e+00 : f32
      %36 = vector.broadcast %cst_21 : f32 to vector<8x128xf32>
      %37 = arith.maximumf %35, %36 : vector<8x128xf32>
      %38 = arith.truncf %37 : vector<8x128xf32> to vector<8x128xbf16>
      %c2_22 = arith.constant 2 : index
      %c0_23 = arith.constant 0 : index
      %c0_24 = arith.constant 0 : index
      %39 = vector.load %arg11[%c2_22, %c0_23, %c0_24] : memref<3x128x128xbf16, #tpu.memory_space<vmem>>, vector<1x128x128xbf16>
      %40 = vector.shape_cast %39 : vector<1x128x128xbf16> to vector<128x128xbf16>
      %cst_25 = arith.constant dense<0.000000e+00> : vector<8x128xf32>
      %41 = tpu.matmul %38, %40, %cst_25 {dimension_numbers = #tpu.dot_dimension_numbers<[1], [0], [0], [1], [0, 0, 1, 1], [], []>} : vector<8x128xbf16>, vector<128x128xbf16>, vector<8x128xf32> -> vector<8x128xf32>
      %c2_26 = arith.constant 2 : index
      %c0_27 = arith.constant 0 : index
      %c0_28 = arith.constant 0 : index
      %42 = vector.load %arg12[%c2_26, %c0_27, %c0_28] : memref<3x1x128xf32, #tpu.memory_space<vmem>>, vector<1x1x128xf32>
      %43 = vector.shape_cast %42 : vector<1x1x128xf32> to vector<1x128xf32>
      %44 = vector.broadcast %43 : vector<1x128xf32> to vector<8x128xf32>
      %45 = arith.addf %41, %44 : vector<8x128xf32>
      %c0_29 = arith.constant 0 : index
      %c0_30 = arith.constant 0 : index
      %46 = vector.load %arg4[%c0_29, %c0_30] : memref<8x1xi32, #tpu.memory_space<vmem>>, vector<8x1xi32>
      %c2_i32_31 = arith.constant 2 : i32
      %47 = vector.broadcast %c2_i32_31 : i32 to vector<8x1xi32>
      %48 = arith.cmpi eq, %46, %47 : vector<8x1xi32>
      %c0_32 = arith.constant 0 : index
      %c0_33 = arith.constant 0 : index
      %49 = vector.load %arg13[%c0_32, %c0_33] : memref<8x128xf32, #tpu.memory_space<vmem>>, vector<8x128xf32>
      %50 = vector.shape_cast %48 : vector<8x1xi1> to vector<8x1xi1>
      %51 = vector.broadcast %50 : vector<8x1xi1> to vector<8x128xi1>
      %52 = arith.select %51, %45, %49 : vector<8x128xi1>, vector<8x128xf32>
      %c0_34 = arith.constant 0 : index
      %c0_35 = arith.constant 0 : index
      %53 = vector.load %arg13[%c0_34, %c0_35] : memref<8x128xf32, #tpu.memory_space<vmem>>, vector<8x128xf32>
      tpu.vector_store %arg13[%c0_34, %c0_35], %52 {strides = array<i32>} : memref<8x128xf32, #tpu.memory_space<vmem>>, vector<8x128xf32>,
    } else {
    }
    return
  }
  func.func @transform_0(%arg0: i32, %arg1: memref<1xi32, #tpu.memory_space<smem>>, %arg2: memref<3xi32, #tpu.memory_space<smem>>) -> (i32, i32) {
    %c0_i32 = arith.constant 0 : i32
    %c0_i32_0 = arith.constant 0 : i32
    return %arg0, %c0_i32 : i32, i32
  }
  func.func @transform_1(%arg0: i32, %arg1: memref<1xi32, #tpu.memory_space<smem>>, %arg2: memref<3xi32, #tpu.memory_space<smem>>) -> (i32, i32) {
    %c0_i32 = arith.constant 0 : i32
    %c0_i32_0 = arith.constant 0 : i32
    return %arg0, %c0_i32 : i32, i32
  }
  func.func @transform_2(%arg0: i32, %arg1: memref<1xi32, #tpu.memory_space<smem>>, %arg2: memref<3xi32, #tpu.memory_space<smem>>) -> (i32, i32) {
    %c0_i32 = arith.constant 0 : i32
    %c0_i32_0 = arith.constant 0 : i32
    %c0_i32_1 = arith.constant 0 : i32
    return %c0_i32, %c0_i32_0 : i32, i32
  }
  func.func @transform_3(%arg0: i32, %arg1: memref<1xi32, #tpu.memory_space<smem>>, %arg2: memref<3xi32, #tpu.memory_space<smem>>) -> (i32, i32) {
    %c0_i32 = arith.constant 0 : i32
    %c0_i32_0 = arith.constant 0 : i32
    %c0_i32_1 = arith.constant 0 : i32
    return %c0_i32, %c0_i32_0 : i32, i32
  }
  func.func @transform_4(%arg0: i32, %arg1: memref<1xi32, #tpu.memory_space<smem>>, %arg2: memref<3xi32, #tpu.memory_space<smem>>) -> (i32, i32, i32) {
    %c0_i32 = arith.constant 0 : i32
    %c0_i32_0 = arith.constant 0 : i32
    %c0_i32_1 = arith.constant 0 : i32
    %c0_i32_2 = arith.constant 0 : i32
    return %c0_i32, %c0_i32_0, %c0_i32_1 : i32, i32, i32
  }
  func.func @transform_5(%arg0: i32, %arg1: memref<1xi32, #tpu.memory_space<smem>>, %arg2: memref<3xi32, #tpu.memory_space<smem>>) -> (i32, i32, i32) {
    %c0_i32 = arith.constant 0 : i32
    %c0_i32_0 = arith.constant 0 : i32
    %c0_i32_1 = arith.constant 0 : i32
    %c0_i32_2 = arith.constant 0 : i32
    return %c0_i32, %c0_i32_0, %c0_i32_1 : i32, i32, i32
  }
  func.func @transform_6(%arg0: i32, %arg1: memref<1xi32, #tpu.memory_space<smem>>, %arg2: memref<3xi32, #tpu.memory_space<smem>>) -> (i32, i32, i32, i32) {
    %c0_i32 = arith.constant 0 : i32
    %c0_i32_0 = arith.constant 0 : i32
    %c0_i32_1 = arith.constant 0 : i32
    %c0_i32_2 = arith.constant 0 : i32
    %c0_i32_3 = arith.constant 0 : i32
    return %c0_i32, %c0_i32_0, %c0_i32_1, %c0_i32_2 : i32, i32, i32, i32
  }
  func.func @transform_7(%arg0: i32, %arg1: memref<1xi32, #tpu.memory_space<smem>>, %arg2: memref<3xi32, #tpu.memory_space<smem>>) -> (i32, i32, i32, i32) {
    %c0_i32 = arith.constant 0 : i32
    %c0_i32_0 = arith.constant 0 : i32
    %c0_i32_1 = arith.constant 0 : i32
    %c0_i32_2 = arith.constant 0 : i32
    %c0_i32_3 = arith.constant 0 : i32
    return %c0_i32, %c0_i32_0, %c0_i32_1, %c0_i32_2 : i32, i32, i32, i32
  }
  func.func @transform_8(%arg0: i32, %arg1: memref<1xi32, #tpu.memory_space<smem>>, %arg2: memref<3xi32, #tpu.memory_space<smem>>) -> (i32, i32, i32) {
    %c0_i32 = arith.constant 0 : i32
    %c0_i32_0 = arith.constant 0 : i32
    %c0_i32_1 = arith.constant 0 : i32
    %c0_i32_2 = arith.constant 0 : i32
    return %c0_i32, %c0_i32_0, %c0_i32_1 : i32, i32, i32
  }
  func.func @transform_9(%arg0: i32, %arg1: memref<1xi32, #tpu.memory_space<smem>>, %arg2: memref<3xi32, #tpu.memory_space<smem>>) -> (i32, i32, i32) {
    %c0_i32 = arith.constant 0 : i32
    %c0_i32_0 = arith.constant 0 : i32
    %c0_i32_1 = arith.constant 0 : i32
    %c0_i32_2 = arith.constant 0 : i32
    return %c0_i32, %c0_i32_0, %c0_i32_1 : i32, i32, i32
  }
  func.func @transform_10(%arg0: i32, %arg1: memref<1xi32, #tpu.memory_space<smem>>, %arg2: memref<3xi32, #tpu.memory_space<smem>>) -> (i32, i32) {
    %c0_i32 = arith.constant 0 : i32
    %c0_i32_0 = arith.constant 0 : i32
    return %arg0, %c0_i32 : i32, i32
  }
}

</mosaic_0001>

<bundles_post_ra>
// kernel: tpu_custom_call.1
= control target key start
LH: loop header
LB: loop body
LE: loop exit
PB: predicated region body
PF: predicated region fallthrough
CT: control target
= control target key end

     0   :  { %s2029_s0 = inlined_call_operand.<no memory space> [shape: s32[1], index: 0, kind: input, shape index: {}]   ;;  %s2030_s1 = inlined_call_operand.hbm [shape: s32[3], index: 1, kind: input, shape index: {}]   ;;  %s2031_s2 = inlined_call_operand.vmem [shape: bf16[8,128], index: 2, kind: input, shape index: {}]   ;;  %s2032_s3 = inlined_call_operand.vmem [shape: s32[8,1], index: 3, kind: input, shape index: {}]   ;;  %s2033_s4 = inlined_call_operand.hbm [shape: bf16[128,128], index: 4, kind: input, shape index: {}]   ;;  %s2034_s5 = inlined_call_operand.vmem [shape: f32[1,128], index: 5, kind: input, shape index: {}]   ;;  %s2035_s6 = inlined_call_operand.hbm [shape: bf16[2,128,128], index: 6, kind: input, shape index: {}]   ;;  %s2036_s7 = inlined_call_operand.vmem [shape: f32[2,1,128], index: 7, kind: input, shape index: {}]   ;;  %s2037_s8 = inlined_call_operand.hbm [shape: bf16[3,1,128,128], index: 8, kind: input, shape index: {}]   ;;  %s2038_s9 = inlined_call_operand.vmem [shape: f32[3,1,1,128], index: 9, kind: input, shape index: {}]   ;;  %s2039_s10 = inlined_call_operand.hbm [shape: bf16[3,128,128], index: 10, kind: input, shape index: {}]   ;;  %s2040_s11 = inlined_call_operand.vmem [shape: f32[3,1,128], index: 11, kind: input, shape index: {}]   ;;  %s2041_s12 = inlined_call_operand.hbm [shape: f32[8,128], index: 12, kind: output, shape index: {}]  }
   0x1   :  { %s1644_s23 = scalar_lea.hbm %s2030_s1, 16 }
   0x2   :  { %p1645_p0 = scmp.ne.s32.totalorder %s2030_s1, %s1644_s23  ;;  %p1648_p1 = scmp.lt.u32.totalorder %s1644_s23, %s2030_s1 }
   0x4   :  { %p1650_p2 = pnand %p1648_p1, %p1645_p0 }
   0x6   :  { %1653 = shalt.err (!%p1650_p2)  }
   0x7   :  { %s1774_s28 = smov [#allocation5]  }
   0x8   :  { %19 = dma.hbm_to_smem %s2030_s1, 16, %s1774_s28, [#allocation3] }
   0x9   :  { %1764 = dma.done.wait [#allocation3], 16 }
   0xa   :  { %1765 = vsyncadd [#allocation3], 4294967280 }
   0xb   :  { %21 = sfence }
   0xc   :  { %22 = vsyncpa [#allocation7], 0 }
   0xd   :  { %23 = vsyncpa [#allocation10], 0 }
   0xe   :  { %24 = vsyncpa [#allocation13], 0 }
   0xf   :  { %25 = vsyncpa [#allocation8], 0  ;;  %s1775_s13 = smov [#allocation9]   ;;  %s1776_s15 = smov [#allocation6]  }
  0x10   :  { %s49_s14 = sshll.u32 %s1775_s13, 4  ;;  %s35_s16 = sshll.u32 %s1776_s15, 4  ;;  %s50_s14 = int_to_ptr.vmem [resolvable:$true] %s49_s14  ;;  %s1871_s16 = int_to_ptr.vmem [resolvable:$true] %s35_s16 }
  0x11   :  { %s1654_s19 = scalar_lea.hbm %s2035_s6, 2048 }
  0x12   :  { %p1655_p3 = scmp.ne.s32.totalorder %s2035_s6, %s1654_s19  ;;  %p1658_p4 = scmp.lt.u32.totalorder %s1654_s19, %s2035_s6 }
  0x14   :  { %p1660_p5 = pnand %p1658_p4, %p1655_p3 }
  0x16   :  { %1663 = shalt.err (!%p1660_p5)
}
  0x17   :  { %s1664_s23 = scalar_lea.vmem %s50_s14, 2048  ;;  %p1669_p7 = scmp.lt.s32.totalorder %s50_s14, %s50_s14 }
  0x18   :  { %p1665_p6 = scmp.ne.s32.totalorder %s50_s14, %s1664_s23  ;;  %p1670_p8 = scmp.lt.s32.totalorder %s1664_s23, %s1664_s23 }
  0x1a   :  { %p1671_p9 = por %p1670_p8, %p1669_p7 }
  0x1c   :  { %p1672_p10 = pnand %p1671_p9, %p1665_p6 }
  0x1e   :  { %1675 = shalt.err (!%p1672_p10)
}
  0x1f   :  { %s1777_s24 = smov 64   ;;  %s1778_s25 = smov 4  }
  0x20   :  { %55 = dma.hbm_to_vmem [thread:$0]  %s2035_s6, 2048, %s50_s14, [#allocation10], %s1777_s24, %s1777_s24, %s1778_s25  }
  0x21   :  { %s1676_s30 = scalar_lea.hbm %s2033_s4, 1024 }
  0x22   :  { %p1677_p11 = scmp.ne.s32.totalorder %s2033_s4, %s1676_s30  ;;  %p1680_p12 = scmp.lt.u32.totalorder %s1676_s30, %s2033_s4 }
  0x24   :  { %p1682_p13 = pnand %p1680_p12, %p1677_p11 }
  0x26   :  { %1685 = shalt.err (!%p1682_p13)
}
  0x27   :  { %s1686_s19 = scalar_lea.vmem %s1871_s16, 1024  ;;  %p1691_p1 = scmp.lt.s32.totalorder %s1871_s16, %s1871_s16 }
  0x28   :  { %p1687_p0 = scmp.ne.s32.totalorder %s1871_s16, %s1686_s19  ;;  %p1692_p2 = scmp.lt.s32.totalorder %s1686_s19, %s1686_s19 }
  0x2a   :  { %p1693_p3 = por %p1692_p2, %p1691_p1 }
  0x2c   :  { %p1694_p4 = pnand %p1693_p3, %p1687_p0 }
  0x2e   :  { %1697 = shalt.err (!%p1694_p4)
}
  0x2f   :  { %41 = dma.hbm_to_vmem [thread:$0]  %s2033_s4, 1024, %s1871_s16, [#allocation7], %s1777_s24, %s1777_s24, %s1778_s25  }
  0x30   :  { %s1779_s20 = smov [#allocation11]   ;;  %s1780_s21 = smov [#allocation12]  }
  0x31   :  { %s63_s1 = sshll.u32 %s1779_s20, 4  ;;  %s77_s22 = sshll.u32 %s1780_s21, 4  ;;  %s64_s1 = int_to_ptr.vmem [resolvable:$true] %s63_s1  ;;  %s1908_s22 = int_to_ptr.vmem [resolvable:$true] %s77_s22 }
  0x32   :  { %s1698_s27 = scalar_lea.hbm %s2037_s8, 3072 }
  0x33   :  { %p1699_p5 = scmp.ne.s32.totalorder %s2037_s8, %s1698_s27  ;;  %p1702_p6 = scmp.lt.u32.totalorder %s1698_s27, %s2037_s8 }
  0x35   :  { %p1704_p7 = pnand %p1702_p6, %p1699_p5 }
  0x37   :  { %1707 = shalt.err (!%p1704_p7)
}
  0x38   :  { %s1708_s4 = scalar_lea.vmem %s64_s1, 3072  ;;  %p1713_p9 = scmp.lt.s32.totalorder %s64_s1, %s64_s1 }
  0x39   :  { %p1709_p8 = scmp.ne.s32.totalorder %s64_s1, %s1708_s4  ;;  %p1714_p10 = scmp.lt.s32.totalorder %s1708_s4, %s1708_s4 }
  0x3b   :  { %p1715_p11 = por %p1714_p10, %p1713_p9 }
  0x3d   :  { %p1716_p12 = pnand %p1715_p11, %p1709_p8 }
  0x3f   :  { %1719 = shalt.err (!%p1716_p12)
}
  0x40   :  { %69 = dma.hbm_to_vmem [thread:$0]  %s2037_s8, 3072, %s64_s1, [#allocation10], %s1777_s24, %s1777_s24, %s1778_s25  }
  0x41   :  { %s1720_s19 = scalar_lea.hbm %s2039_s10, 3072 }
  0x42   :  { %p1721_p13 = scmp.ne.s32.totalorder %s2039_s10, %s1720_s19  ;;  %p1724_p0 = scmp.lt.u32.totalorder %s1720_s19, %s2039_s10 }
  0x44   :  { %p1726_p1 = pnand %p1724_p0, %p1721_p13 }
  0x46   :  { %1729 = shalt.err (!%p1726_p1)
}
  0x47   :  { %s1730_s23 = scalar_lea.vmem %s1908_s22, 3072  ;;  %p1735_p3 = scmp.lt.s32.totalorder %s1908_s22, %s1908_s22 }
  0x48   :  { %p1731_p2 = scmp.ne.s32.totalorder %s1908_s22, %s1730_s23  ;;  %p1736_p4 = scmp.lt.s32.totalorder %s1730_s23, %s1730_s23 }
  0x4a   :  { %p1737_p5 = por %p1736_p4, %p1735_p3 }
  0x4c   :  { %p1738_p6 = pnand %p1737_p5, %p1731_p2 }
  0x4e   :  { %1741 = shalt.err (!%p1738_p6)
}
  0x4f   :  { %83 = dma.hbm_to_vmem [thread:$0]  %s2039_s10, 3072, %s1908_s22, [#allocation13], %s1777_s24, %s1777_s24, %s1778_s25  }
  0x50   :  { %1766 = dma.done.wait [#allocation7], 1024  }
  0x51   :  { %1767 = vsyncadd [#allocation7], 4294966272 }
  0x52   :  { %1768 = dma.done.wait [#allocation10], 5120  }
  0x53   :  { %1769 = vsyncadd [#allocation10], 4294962176 }
  0x54   :  { %1770 = dma.done.wait [#allocation13], 3072  }
  0x55   :  { %1771 = vsyncadd [#allocation13], 4294964224  ;;  %v1781_v0 = vmov 0.0   ;;  %p1196_p7 = scmp.le.s32.totalorder %s2029_s0, 0 }
  0x56   :  { %99 = vst [vmem:[#allocation14] sm:$0xff] %v1781_v0  ;;  %v1569_v1 = vld [vmem:[#allocation6] sm:$0xff] (!%p1196_p7)   ;;  %v1782_v2 = vmov (!%p1196_p7), 0.0   ;;  %v1570_v3 = vld [vmem:[#allocation6 + $0x8] sm:$0xff] (!%p1196_p7)   ;;  %vm1783_vm0 = vmmov (!%p1196_p7), 0   ;;  %v1571_v4 = vld [vmem:[#allocation6 + $0x10] sm:$0xff] (!%p1196_p7)  }
  0x57   :  { %104 = sbr.rel (%p1196_p7) target bundleno = 774 (0x306), region = 61  ;;  %1369 = vmatprep.subr.bf16.mxu0 (!%p1196_p7), %v1782_v2  ;;  %1389 = vmatprep.subr.bf16.mxu1 (!%p1196_p7), %v1782_v2  ;;  %v1577_v5 = vld [vmem:[#allocation9] sm:$0xff] (!%p1196_p7)   ;;  %v1572_v6 = vld [vmem:[#allocation6 + $0x18] sm:$0xff] (!%p1196_p7)   ;;  %v1578_v7 = vld [vmem:[#allocation9 + $0x8] sm:$0xff] (!%p1196_p7)  }
  0x58   :  { %1370 = vmatpush3.bf16.msra.mxu0 (!%p1196_p7), %v1569_v1  ;;  %1385 = vmatprep.mubr.msk.bf16.mxu0 (!%p1196_p7), %vm1783_vm0, %v1782_v2  ;;  %v1573_v8 = vld [vmem:[#allocation6 + $0x20] sm:$0xff] (!%p1196_p7)   ;;  %v1579_v9 = vld [vmem:[#allocation9 + $0x10] sm:$0xff] (!%p1196_p7)   ;;  %v1574_v10 = vld [vmem:[#allocation6 + $0x28] sm:$0xff] (!%p1196_p7)  }
  0x59   :  { %1371 = vmatprep.subr.bf16.mxu0 (!%p1196_p7), %v1782_v2  ;;  %1405 = vmatprep.mubr.msk.bf16.mxu1 (!%p1196_p7), %vm1783_vm0, %v1782_v2  ;;  %v1580_v11 = vld [vmem:[#allocation9 + $0x18] sm:$0xff] (!%p1196_p7)   ;;  %v1575_v12 = vld [vmem:[#allocation6 + $0x30] sm:$0xff] (!%p1196_p7)   ;;  %v1581_v13 = vld [vmem:[#allocation9 + $0x20] sm:$0xff] (!%p1196_p7)  }
  0x5a   :  { %1390 = vmatpush3.bf16.msra.mxu1 (!%p1196_p7), %v1577_v5  ;;  %v1576_v14 = vld [vmem:[#allocation6 + $0x38] sm:$0xff] (!%p1196_p7)   ;;  %v1582_v15 = vld [vmem:[#allocation9 + $0x28] sm:$0xff] (!%p1196_p7)   ;;  %v1583_v17 = vld [vmem:[#allocation9 + $0x30] sm:$0xff] (!%p1196_p7)  }
  0x5b   :  { %1391 = vmatprep.subr.bf16.mxu1 (!%p1196_p7), %v1782_v2  ;;  %v105_v16 = vld [vmem:[%s2031_s2] sm:$0xf] (!%p1196_p7)  ;;  %v1585_v19 = vld [vmem:[#allocation9 + $0x40] sm:$0xff] (!%p1196_p7)   ;;  %v1586_v20 = vld [vmem:[#allocation9 + $0x48] sm:$0xff] (!%p1196_p7)  }
  0x5c   :  { %1372 = vmatpush3.bf16.msra.mxu0 (!%p1196_p7), %v1570_v3  ;;  %v1584_v18 = vld [vmem:[#allocation9 + $0x38] sm:$0xff] (!%p1196_p7)   ;;  %v1587_v21 = vld [vmem:[#allocation9 + $0x50] sm:$0xff] (!%p1196_p7)   ;;  %v1589_v23 = vld [vmem:[#allocation9 + $0x60] sm:$0xff] (!%p1196_p7)  }
  0x5d   :  { %1373 = vmatprep.subr.bf16.mxu0 (!%p1196_p7), %v1782_v2  ;;  %v1588_v22 = vld [vmem:[#allocation9 + $0x58] sm:$0xff] (!%p1196_p7)   ;;  %v1590_v24 = vld [vmem:[#allocation9 + $0x68] sm:$0xff] (!%p1196_p7)   ;;  %v1591_v33 = vld [vmem:[#allocation9 + $0x70] sm:$0xff] (!%p1196_p7)  }
  0x5e   :  { %1392 = vmatpush3.bf16.msra.mxu1 %v1578_v7  ;;  %v1197_v25 = vld [vmem:[%s2034_s5] ss:$0 sm:$0xff]  ;;  %v1216_v43 = vld [vmem:[%s2036_s7 + $0x1] ss:$0 sm:$0xff] }
  0x5f   :  { %1393 = vmatprep.subr.bf16.mxu1 %v1782_v2  ;;  %v1592_v34 = vld [vmem:[#allocation9 + $0x78] sm:$0xff]  }
  0x60   :  { %1374 = vmatpush3.bf16.msra.mxu0 %v1571_v4  ;;  %v1206_v35 = vld [vmem:[%s2036_s7] ss:$0 sm:$0xff] }
  0x61   :  { %1375 = vmatprep.subr.bf16.mxu0 %v1782_v2 }
  0x62   :  { %1394 = vmatpush3.bf16.msra.mxu1 %v1579_v9 }
  0x63   :  { %1395 = vmatprep.subr.bf16.mxu1 %v1782_v2 }
  0x64   :  { %1376 = vmatpush3.bf16.msra.mxu0 %v1572_v6 }
  0x65   :  { %1377 = vmatprep.subr.bf16.mxu0 %v1782_v2 }
  0x66   :  { %1396 = vmatpush3.bf16.msra.mxu1 %v1580_v11 }
  0x67   :  { %1397 = vmatprep.subr.bf16.mxu1 %v1782_v2 }
  0x68   :  { %1378 = vmatpush3.bf16.msra.mxu0 %v1573_v8 }
  0x69   :  { %1379 = vmatprep.subr.bf16.mxu0 %v1782_v2 }
  0x6a   :  { %1398 = vmatpush3.bf16.msra.mxu1 %v1581_v13 }
  0x6b   :  { %1399 = vmatprep.subr.bf16.mxu1 %v1782_v2 }
  0x6c   :  { %1380 = vmatpush3.bf16.msra.mxu0 %v1574_v10 }
  0x6d   :  { %1381 = vmatprep.subr.bf16.mxu0 %v1782_v2 }
  0x6e   :  { %1400 = vmatpush3.bf16.msra.mxu1 %v1582_v15 }
  0x6f   :  { %1401 = vmatprep.subr.bf16.mxu1 %v1782_v2 }
  0x70   :  { %1382 = vmatpush3.bf16.msra.mxu0 %v1575_v12 }
  0x71   :  { %1383 = vmatprep.subr.bf16.mxu0 %v1782_v2 }
  0x72   :  { %1402 = vmatpush3.bf16.msra.mxu1 %v1583_v17 }
  0x73   :  { %1403 = vmatprep.subr.bf16.mxu1 %v1782_v2 }
  0x74   :  { %1384 = vmatpush3.bf16.msra.mxu0 %v1576_v14 }
  0x75   :  { %1409 = vmatprep.subr.bf16.mxu0 %v1782_v2 }
  0x76   :  { %1404 = vmatpush3.bf16.msra.mxu1 %v1584_v18 }
  0x77   :  { %1386 = vmatmul.mubr.bf16.vlgmr.msra.gmra.mrb[0].mxu0 %v105_v16 }
  0x78   :  { %1425 = vmatprep.mubr.msk.bf16.mxu0 %vm1783_vm0, %v1782_v2  ;;  %1410 = vmatpush3.bf16.msra.mxu0 %v1585_v19 }
  0x79   :  { %1411 = vmatprep.subr.bf16.mxu0 %v1782_v2 }
  0x7c   :  { %1412 = vmatpush3.bf16.msra.mxu0 %v1586_v20 }
  0x7d   :  { %1413 = vmatprep.subr.bf16.mxu0 %v1782_v2 }
  0x80   :  { %1414 = vmatpush3.bf16.msra.mxu0 %v1587_v21 }
  0x81   :  { %1415 = vmatprep.subr.bf16.mxu0 %v1782_v2 }
  0x84   :  { %1416 = vmatpush3.bf16.msra.mxu0 %v1588_v22 }
  0x85   :  { %1417 = vmatprep.subr.bf16.mxu0 %v1782_v2 }
  0x88   :  { %1418 = vmatpush3.bf16.msra.mxu0 %v1589_v23 }
  0x89   :  { %1419 = vmatprep.subr.bf16.mxu0 %v1782_v2 }
  0x8c   :  { %1420 = vmatpush3.bf16.msra.mxu0 %v1590_v24 }
  0x8d   :  { %1421 = vmatprep.subr.bf16.mxu0 %v1782_v2 }
  0x90   :  { %1422 = vmatpush3.bf16.msra.mxu0 %v1591_v33 }
  0x91   :  { %1423 = vmatprep.subr.bf16.mxu0 %v1782_v2 }
  0x94   :  { %1424 = vmatpush3.bf16.msra.mxu0 %v1592_v34 }
 0x14a   :  { %v211_v26 = vpop.f32.mrb[0].mxu0 }
 0x14b   :  { %v212_v27 = vadd.f32 %v1197_v25, %v211_v26  ;;  %v1387_v28 = vpop.f32.mrb[1].mxu0 }
 0x14c   :  { %v214_v29 = vpop.f32.mrb[2].mxu0 }
 0x14d   :  { %v217_v30 = vmax.f32 %v212_v27, 0.0  ;;  %v1388_v31 = vpop.f32.mrb[3].mxu0 }
 0x14f   :  { %v218_v32 = vpack.c.bf16 %v217_v30, %v217_v30 }
 0x151   :  { %1406 = vmatmul.mubr.bf16.vlgmr.msra.gmra.mrb[0].mxu1 %v218_v32 }
 0x224   :  { %v324_v36 = vpop.f32.mrb[0].mxu1 }
 0x225   :  { %v325_v37 = vadd.f32 %v1206_v35, %v324_v36  ;;  %v1407_v38 = vpop.f32.mrb[1].mxu1 }
 0x226   :  { %v327_v39 = vpop.f32.mrb[2].mxu1 }
 0x227   :  { %v330_v40 = vmax.f32 %v325_v37, 0.0  ;;  %v1408_v41 = vpop.f32.mrb[3].mxu1 }
 0x229   :  { %v331_v42 = vpack.c.bf16 %v330_v40, %v330_v40 }
 0x22b   :  { %1426 = vmatmul.mubr.bf16.vlgmr.msra.gmra.mrb[4].mxu0 %v331_v42 }
 0x2fe   :  { %v439_v44 = vpop.f32.mrb[4].mxu0 }
 0x2ff   :  { %v440_v45 = vadd.f32 %v1216_v43, %v439_v44  ;;  %v1427_v46 = vpop.f32.mrb[5].mxu0 }
 0x300   :  { %v442_v47 = vpop.f32.mrb[6].mxu0 }
 0x301   :  { %v445_v48 = vmax.f32 %v440_v45, 0.0  ;;  %v1428_v49 = vpop.f32.mrb[7].mxu0 }
 0x303   :  { %v446_v50 = vpack.c.bf16 %v445_v48, %v445_v48 }
 0x305   :  { %447 = vst [vmem:[#allocation2] sm:$0xf] %v446_v50 }
 0x306 PF:  { %s449_s29 = sld [smem:[#allocation5]] }
 0x30c   :  { %p1225_p8 = scmp.le.s32.totalorder %s449_s29, 0 }
 0x30d   :  { %v1594_v51 = vld [vmem:[#allocation11] sm:$0xff] (!%p1225_p8)   ;;  %v1784_v52 = vmov (!%p1225_p8), 0.0   ;;  %v1595_v53 = vld [vmem:[#allocation11 + $0x8] sm:$0xff] (!%p1225_p8)   ;;  %vm1785_vm1 = vmmov (!%p1225_p8), 0   ;;  %v1596_v54 = vld [vmem:[#allocation11 + $0x10] sm:$0xff] (!%p1225_p8)   ;;  %v1786_v6 = vmov (!%p1225_p8), 0  }
 0x30e   :  { %453 = sbr.rel (%p1225_p8) target bundleno = 1248 (0x4e0), region = 65  ;;  %1429 = vmatprep.subr.bf16.mxu0 (!%p1225_p8), %v1784_v52  ;;  %1449 = vmatprep.subr.bf16.mxu1 (!%p1225_p8), %v1784_v52  ;;  %v1602_v55 = vld [vmem:[#allocation12] sm:$0xff] (!%p1225_p8)   ;;  %v1597_v56 = vld [vmem:[#allocation11 + $0x18] sm:$0xff] (!%p1225_p8)   ;;  %v1603_v57 = vld [vmem:[#allocation12 + $0x8] sm:$0xff] (!%p1225_p8)  }
 0x30f   :  { %1430 = vmatpush3.bf16.msra.mxu0 (!%p1225_p8), %v1594_v51  ;;  %1445 = vmatprep.mubr.msk.bf16.mxu0 (!%p1225_p8), %vm1785_vm1, %v1784_v52  ;;  %v1598_v58 = vld [vmem:[#allocation11 + $0x20] sm:$0xff] (!%p1225_p8)   ;;  %v1604_v59 = vld [vmem:[#allocation12 + $0x10] sm:$0xff] (!%p1225_p8)   ;;  %v1599_v60 = vld [vmem:[#allocation11 + $0x28] sm:$0xff] (!%p1225_p8)  }
 0x310   :  { %1431 = vmatprep.subr.bf16.mxu0 (!%p1225_p8), %v1784_v52  ;;  %1465 = vmatprep.mubr.msk.bf16.mxu1 (!%p1225_p8), %vm1785_vm1, %v1784_v52  ;;  %v1605_v61 = vld [vmem:[#allocation12 + $0x18] sm:$0xff] (!%p1225_p8)   ;;  %v1600_v62 = vld [vmem:[#allocation11 + $0x30] sm:$0xff] (!%p1225_p8)   ;;  %v1606_v63 = vld [vmem:[#allocation12 + $0x20] sm:$0xff] (!%p1225_p8)  }
 0x311   :  { %1450 = vmatpush3.bf16.msra.mxu1 (!%p1225_p8), %v1602_v55  ;;  %v1601_v0 = vld [vmem:[#allocation11 + $0x38] sm:$0xff] (!%p1225_p8)   ;;  %v1607_v1 = vld [vmem:[#allocation12 + $0x28] sm:$0xff] (!%p1225_p8)   ;;  %v1608_v3 = vld [vmem:[#allocation12 + $0x30] sm:$0xff] (!%p1225_p8)   ;;  %1593 = vset.pattern.permute.xlu0 (!%p1225_p8), %v1786_v6 }
 0x312   :  { %1451 = vmatprep.subr.bf16.mxu1 (!%p1225_p8), %v1784_v52  ;;  %v454_v2 = vld [vmem:[#allocation2] sm:$0xf] (!%p1225_p8)  ;;  %v681_v19 = vld [vmem:[#allocation14] sm:$0xff] (!%p1225_p8) }
 0x313   :  { %1432 = vmatpush3.bf16.msra.mxu0 (!%p1225_p8), %v1595_v53  ;;  %v1609_v4 = vld [vmem:[#allocation12 + $0x38] sm:$0xff] (!%p1225_p8)  }
 0x314   :  { %1433 = vmatprep.subr.bf16.mxu0 (!%p1225_p8), %v1784_v52  ;;  %v679_v5 = vld [vmem:[%s2032_s3] sm:$0xff] (!%p1225_p8) }
 0x315   :  { %1452 = vmatpush3.bf16.msra.mxu1 %v1603_v57  ;;  %vm680_vm2 = vcmp.eq.s32.totalorder %v679_v5, 0  ;;  %v1226_v8 = vld [vmem:[%s2038_s9] ss:$0 sm:$0xff] }
 0x316   :  { %1453 = vmatprep.subr.bf16.mxu1 %v1784_v52  ;;  %v682_v7 = vsel %vm680_vm2, 1, %v1786_v6  ;;  %v1235_v17 = vld [vmem:[%s2040_s11] ss:$0 sm:$0xff] }
 0x317   :  { %1434 = vmatpush3.bf16.msra.mxu0 %v1596_v54  ;;  %684 = vperm.xlu0 %1593, %v682_v7  }
 0x318   :  { %1435 = vmatprep.subr.bf16.mxu0 %v1784_v52 }
 0x319   :  { %1454 = vmatpush3.bf16.msra.mxu1 %v1604_v59 }
 0x31a   :  { %1455 = vmatprep.subr.bf16.mxu1 %v1784_v52 }
 0x31b   :  { %1436 = vmatpush3.bf16.msra.mxu0 %v1597_v56 }
 0x31c   :  { %1437 = vmatprep.subr.bf16.mxu0 %v1784_v52 }
 0x31d   :  { %1456 = vmatpush3.bf16.msra.mxu1 %v1605_v61 }
 0x31e   :  { %1457 = vmatprep.subr.bf16.mxu1 %v1784_v52 }
 0x31f   :  { %1438 = vmatpush3.bf16.msra.mxu0 %v1598_v58 }
 0x320   :  { %1439 = vmatprep.subr.bf16.mxu0 %v1784_v52 }
 0x321   :  { %1458 = vmatpush3.bf16.msra.mxu1 %v1606_v63 }
 0x322   :  { %1459 = vmatprep.subr.bf16.mxu1 %v1784_v52 }
 0x323   :  { %1440 = vmatpush3.bf16.msra.mxu0 %v1599_v60 }
 0x324   :  { %1441 = vmatprep.subr.bf16.mxu0 %v1784_v52 }
 0x325   :  { %1460 = vmatpush3.bf16.msra.mxu1 %v1607_v1 }
 0x326   :  { %1461 = vmatprep.subr.bf16.mxu1 %v1784_v52 }
 0x327   :  { %1442 = vmatpush3.bf16.msra.mxu0 %v1600_v62 }
 0x328   :  { %1443 = vmatprep.subr.bf16.mxu0 %v1784_v52 }
 0x329   :  { %1462 = vmatpush3.bf16.msra.mxu1 %v1608_v3 }
 0x32a   :  { %1463 = vmatprep.subr.bf16.mxu1 %v1784_v52 }
 0x32b   :  { %1444 = vmatpush3.bf16.msra.mxu0 %v1601_v0 }
 0x32d   :  { %1464 = vmatpush3.bf16.msra.mxu1 %v1609_v4 }
 0x32e   :  { %1446 = vmatmul.mubr.bf16.vlgmr.msra.gmra.mrb[0].mxu0 %v454_v2 }
 0x396   :  { %v685_v16 = vpop.permute.xlu0 %684 }
 0x397   :  { %vm686_vm3 = vcmp.eq.s32.totalorder %v685_v16, 1 }
 0x401   :  { %v560_v9 = vpop.f32.mrb[0].mxu0 }
 0x402   :  { %v561_v10 = vadd.f32 %v1226_v8, %v560_v9  ;;  %v1447_v11 = vpop.f32.mrb[1].mxu0 }
 0x403   :  { %v563_v12 = vpop.f32.mrb[2].mxu0 }
 0x404   :  { %v566_v13 = vmax.f32 %v561_v10, 0.0  ;;  %v1448_v14 = vpop.f32.mrb[3].mxu0 }
 0x406   :  { %v567_v15 = vpack.c.bf16 %v566_v13, %v566_v13 }
 0x408   :  { %1466 = vmatmul.mubr.bf16.vlgmr.msra.gmra.mrb[0].mxu1 %v567_v15 }
 0x4db   :  { %v673_v18 = vpop.f32.mrb[0].mxu1 }
 0x4dc   :  { %v674_v20 = vadd.f32 %v1235_v17, %v673_v18  ;;  %v1467_v21 = vpop.f32.mrb[1].mxu1 }
 0x4dd   :  { %v676_v22 = vpop.f32.mrb[2].mxu1 }
 0x4de   :  { %v687_v23 = vsel %vm686_vm3, %v674_v20, %v681_v19  ;;  %v1468_v24 = vpop.f32.mrb[3].mxu1 }
 0x4df   :  { %688 = vst [vmem:[#allocation14] sm:$0xff] %v687_v23 }
 0x4e0 PF:  { %s1244_s17 = sld [smem:[#allocation5 + $0x1]] }
 0x4e6   :  { %p1245_p9 = scmp.le.s32.totalorder %s1244_s17, 0 }
 0x4e7   :  { %v1611_v25 = vld [vmem:[#allocation11 + $0x40] sm:$0xff] (!%p1245_p9)   ;;  %v1787_v26 = vmov (!%p1245_p9), 0.0   ;;  %v1612_v27 = vld [vmem:[#allocation11 + $0x48] sm:$0xff] (!%p1245_p9)   ;;  %vm1788_vm4 = vmmov (!%p1245_p9), 0   ;;  %v1613_v28 = vld [vmem:[#allocation11 + $0x50] sm:$0xff] (!%p1245_p9)   ;;  %v1789_v44 = vmov (!%p1245_p9), 0  }
 0x4e8   :  { %694 = sbr.rel (%p1245_p9) target bundleno = 1722 (0x6ba), region = 69  ;;  %1469 = vmatprep.subr.bf16.mxu0 (!%p1245_p9), %v1787_v26  ;;  %1489 = vmatprep.subr.bf16.mxu1 (!%p1245_p9), %v1787_v26  ;;  %v1619_v29 = vld [vmem:[#allocation12 + $0x40] sm:$0xff] (!%p1245_p9)   ;;  %v1614_v30 = vld [vmem:[#allocation11 + $0x58] sm:$0xff] (!%p1245_p9)   ;;  %v1620_v31 = vld [vmem:[#allocation12 + $0x48] sm:$0xff] (!%p1245_p9)  }
 0x4e9   :  { %1470 = vmatpush3.bf16.msra.mxu0 (!%p1245_p9), %v1611_v25  ;;  %1485 = vmatprep.mubr.msk.bf16.mxu0 (!%p1245_p9), %vm1788_vm4, %v1787_v26  ;;  %v1615_v32 = vld [vmem:[#allocation11 + $0x60] sm:$0xff] (!%p1245_p9)   ;;  %v1621_v33 = vld [vmem:[#allocation12 + $0x50] sm:$0xff] (!%p1245_p9)   ;;  %v1616_v34 = vld [vmem:[#allocation11 + $0x68] sm:$0xff] (!%p1245_p9)  }
 0x4ea   :  { %1471 = vmatprep.subr.bf16.mxu0 (!%p1245_p9), %v1787_v26  ;;  %1505 = vmatprep.mubr.msk.bf16.mxu1 (!%p1245_p9), %vm1788_vm4, %v1787_v26  ;;  %v1622_v35 = vld [vmem:[#allocation12 + $0x58] sm:$0xff] (!%p1245_p9)   ;;  %v1617_v36 = vld [vmem:[#allocation11 + $0x70] sm:$0xff] (!%p1245_p9)   ;;  %v1623_v37 = vld [vmem:[#allocation12 + $0x60] sm:$0xff] (!%p1245_p9)  }
 0x4eb   :  { %1490 = vmatpush3.bf16.msra.mxu1 (!%p1245_p9), %v1619_v29  ;;  %v1618_v38 = vld [vmem:[#allocation11 + $0x78] sm:$0xff] (!%p1245_p9)   ;;  %v1624_v39 = vld [vmem:[#allocation12 + $0x68] sm:$0xff] (!%p1245_p9)   ;;  %v1625_v41 = vld [vmem:[#allocation12 + $0x70] sm:$0xff] (!%p1245_p9)   ;;  %1610 = vset.pattern.permute.xlu0 (!%p1245_p9), %v1789_v44 }
 0x4ec   :  { %1491 = vmatprep.subr.bf16.mxu1 (!%p1245_p9), %v1787_v26  ;;  %v695_v40 = vld [vmem:[#allocation2] sm:$0xf] (!%p1245_p9)  ;;  %v926_v57 = vld [vmem:[#allocation14] sm:$0xff] (!%p1245_p9) }
 0x4ed   :  { %1472 = vmatpush3.bf16.msra.mxu0 (!%p1245_p9), %v1612_v27  ;;  %v1626_v42 = vld [vmem:[#allocation12 + $0x78] sm:$0xff] (!%p1245_p9)  }
 0x4ee   :  { %1473 = vmatprep.subr.bf16.mxu0 (!%p1245_p9), %v1787_v26  ;;  %v924_v43 = vld [vmem:[%s2032_s3] sm:$0xff] (!%p1245_p9) }
 0x4ef   :  { %1492 = vmatpush3.bf16.msra.mxu1 %v1620_v31  ;;  %vm925_vm5 = vcmp.eq.s32.totalorder %v924_v43, 1  ;;  %v1247_v46 = vld [vmem:[%s2038_s9 + $0x1] ss:$0 sm:$0xff] }
 0x4f0   :  { %1493 = vmatprep.subr.bf16.mxu1 %v1787_v26  ;;  %v927_v45 = vsel %vm925_vm5, 1, %v1789_v44  ;;  %v1257_v55 = vld [vmem:[%s2040_s11 + $0x1] ss:$0 sm:$0xff] }
 0x4f1   :  { %1474 = vmatpush3.bf16.msra.mxu0 %v1613_v28  ;;  %929 = vperm.xlu0 %1610, %v927_v45  }
 0x4f2   :  { %1475 = vmatprep.subr.bf16.mxu0 %v1787_v26 }
 0x4f3   :  { %1494 = vmatpush3.bf16.msra.mxu1 %v1621_v33 }
 0x4f4   :  { %1495 = vmatprep.subr.bf16.mxu1 %v1787_v26 }
 0x4f5   :  { %1476 = vmatpush3.bf16.msra.mxu0 %v1614_v30 }
 0x4f6   :  { %1477 = vmatprep.subr.bf16.mxu0 %v1787_v26 }
 0x4f7   :  { %1496 = vmatpush3.bf16.msra.mxu1 %v1622_v35 }
 0x4f8   :  { %1497 = vmatprep.subr.bf16.mxu1 %v1787_v26 }
 0x4f9   :  { %1478 = vmatpush3.bf16.msra.mxu0 %v1615_v32 }
 0x4fa   :  { %1479 = vmatprep.subr.bf16.mxu0 %v1787_v26 }
 0x4fb   :  { %1498 = vmatpush3.bf16.msra.mxu1 %v1623_v37 }
 0x4fc   :  { %1499 = vmatprep.subr.bf16.mxu1 %v1787_v26 }
 0x4fd   :  { %1480 = vmatpush3.bf16.msra.mxu0 %v1616_v34 }
 0x4fe   :  { %1481 = vmatprep.subr.bf16.mxu0 %v1787_v26 }
 0x4ff   :  { %1500 = vmatpush3.bf16.msra.mxu1 %v1624_v39 }
 0x500   :  { %1501 = vmatprep.subr.bf16.mxu1 %v1787_v26 }
 0x501   :  { %1482 = vmatpush3.bf16.msra.mxu0 %v1617_v36 }
 0x502   :  { %1483 = vmatprep.subr.bf16.mxu0 %v1787_v26 }
 0x503   :  { %1502 = vmatpush3.bf16.msra.mxu1 %v1625_v41 }
 0x504   :  { %1503 = vmatprep.subr.bf16.mxu1 %v1787_v26 }
 0x505   :  { %1484 = vmatpush3.bf16.msra.mxu0 %v1618_v38 }
 0x507   :  { %1504 = vmatpush3.bf16.msra.mxu1 %v1626_v42 }
 0x508   :  { %1486 = vmatmul.mubr.bf16.vlgmr.msra.gmra.mrb[0].mxu0 %v695_v40 }
 0x570   :  { %v930_v54 = vpop.permute.xlu0 %929 }
 0x571   :  { %vm931_vm6 = vcmp.eq.s32.totalorder %v930_v54, 1 }
 0x5db   :  { %v803_v47 = vpop.f32.mrb[0].mxu0 }
 0x5dc   :  { %v804_v48 = vadd.f32 %v1247_v46, %v803_v47  ;;  %v1487_v49 = vpop.f32.mrb[1].mxu0 }
 0x5dd   :  { %v806_v50 = vpop.f32.mrb[2].mxu0 }
 0x5de   :  { %v809_v51 = vmax.f32 %v804_v48, 0.0  ;;  %v1488_v52 = vpop.f32.mrb[3].mxu0 }
 0x5e0   :  { %v810_v53 = vpack.c.bf16 %v809_v51, %v809_v51 }
 0x5e2   :  { %1506 = vmatmul.mubr.bf16.vlgmr.msra.gmra.mrb[0].mxu1 %v810_v53 }
 0x6b5   :  { %v918_v56 = vpop.f32.mrb[0].mxu1 }
 0x6b6   :  { %v919_v58 = vadd.f32 %v1257_v55, %v918_v56  ;;  %v1507_v59 = vpop.f32.mrb[1].mxu1 }
 0x6b7   :  { %v921_v60 = vpop.f32.mrb[2].mxu1 }
 0x6b8   :  { %v932_v61 = vsel %vm931_vm6, %v919_v58, %v926_v57  ;;  %v1508_v62 = vpop.f32.mrb[3].mxu1 }
 0x6b9   :  { %933 = vst [vmem:[#allocation14] sm:$0xff] %v932_v61 }
 0x6ba PF:  { %s1266_s23 = sld [smem:[#allocation5 + $0x2]] }
 0x6c0   :  { %p1267_p10 = scmp.le.s32.totalorder %s1266_s23, 0 }
 0x6c1   :  { %v1628_v63 = vld [vmem:[#allocation11 + $0x80] sm:$0xff] (!%p1267_p10)   ;;  %v1790_v0 = vmov (!%p1267_p10), 0.0   ;;  %v1629_v1 = vld [vmem:[#allocation11 + $0x88] sm:$0xff] (!%p1267_p10)   ;;  %vm1791_vm7 = vmmov (!%p1267_p10), 0   ;;  %v1630_v2 = vld [vmem:[#allocation11 + $0x90] sm:$0xff] (!%p1267_p10)   ;;  %v1792_v18 = vmov (!%p1267_p10), 0  }
 0x6c2   :  { %939 = sbr.rel (%p1267_p10) target bundleno = 2196 (0x894), region = 73  ;;  %1509 = vmatprep.subr.bf16.mxu0 (!%p1267_p10), %v1790_v0  ;;  %1529 = vmatprep.subr.bf16.mxu1 (!%p1267_p10), %v1790_v0  ;;  %v1636_v3 = vld [vmem:[#allocation12 + $0x80] sm:$0xff] (!%p1267_p10)   ;;  %v1631_v4 = vld [vmem:[#allocation11 + $0x98] sm:$0xff] (!%p1267_p10)   ;;  %v1637_v5 = vld [vmem:[#allocation12 + $0x88] sm:$0xff] (!%p1267_p10)  }
 0x6c3   :  { %1510 = vmatpush3.bf16.msra.mxu0 (!%p1267_p10), %v1628_v63  ;;  %1525 = vmatprep.mubr.msk.bf16.mxu0 (!%p1267_p10), %vm1791_vm7, %v1790_v0  ;;  %v1632_v6 = vld [vmem:[#allocation11 + $0xa0] sm:$0xff] (!%p1267_p10)   ;;  %v1638_v7 = vld [vmem:[#allocation12 + $0x90] sm:$0xff] (!%p1267_p10)   ;;  %v1633_v8 = vld [vmem:[#allocation11 + $0xa8] sm:$0xff] (!%p1267_p10)  }
 0x6c4   :  { %1511 = vmatprep.subr.bf16.mxu0 (!%p1267_p10), %v1790_v0  ;;  %1545 = vmatprep.mubr.msk.bf16.mxu1 (!%p1267_p10), %vm1791_vm7, %v1790_v0  ;;  %v1639_v9 = vld [vmem:[#allocation12 + $0x98] sm:$0xff] (!%p1267_p10)   ;;  %v1634_v10 = vld [vmem:[#allocation11 + $0xb0] sm:$0xff] (!%p1267_p10)   ;;  %v1640_v11 = vld [vmem:[#allocation12 + $0xa0] sm:$0xff] (!%p1267_p10)  }
 0x6c5   :  { %1530 = vmatpush3.bf16.msra.mxu1 (!%p1267_p10), %v1636_v3  ;;  %v1635_v12 = vld [vmem:[#allocation11 + $0xb8] sm:$0xff] (!%p1267_p10)   ;;  %v1641_v13 = vld [vmem:[#allocation12 + $0xa8] sm:$0xff] (!%p1267_p10)   ;;  %v1642_v15 = vld [vmem:[#allocation12 + $0xb0] sm:$0xff] (!%p1267_p10)   ;;  %1627 = vset.pattern.permute.xlu0 (!%p1267_p10), %v1792_v18 }
 0x6c6   :  { %1531 = vmatprep.subr.bf16.mxu1 (!%p1267_p10), %v1790_v0  ;;  %v940_v14 = vld [vmem:[#allocation2] sm:$0xf] (!%p1267_p10)  ;;  %v1171_v31 = vld [vmem:[#allocation14] sm:$0xff] (!%p1267_p10) }
 0x6c7   :  { %1512 = vmatpush3.bf16.msra.mxu0 (!%p1267_p10), %v1629_v1  ;;  %v1643_v16 = vld [vmem:[#allocation12 + $0xb8] sm:$0xff] (!%p1267_p10)  }
 0x6c8   :  { %1513 = vmatprep.subr.bf16.mxu0 (!%p1267_p10), %v1790_v0  ;;  %v1169_v17 = vld [vmem:[%s2032_s3] sm:$0xff] (!%p1267_p10) }
 0x6c9   :  { %1532 = vmatpush3.bf16.msra.mxu1 %v1637_v5  ;;  %vm1170_vm8 = vcmp.eq.s32.totalorder %v1169_v17, 2  ;;  %v1269_v20 = vld [vmem:[%s2038_s9 + $0x2] ss:$0 sm:$0xff] }
 0x6ca   :  { %1533 = vmatprep.subr.bf16.mxu1 %v1790_v0  ;;  %v1172_v19 = vsel %vm1170_vm8, 1, %v1792_v18  ;;  %v1279_v29 = vld [vmem:[%s2040_s11 + $0x2] ss:$0 sm:$0xff] }
 0x6cb   :  { %1514 = vmatpush3.bf16.msra.mxu0 %v1630_v2  ;;  %1174 = vperm.xlu0 %1627, %v1172_v19  }
 0x6cc   :  { %1515 = vmatprep.subr.bf16.mxu0 %v1790_v0 }
 0x6cd   :  { %1534 = vmatpush3.bf16.msra.mxu1 %v1638_v7 }
 0x6ce   :  { %1535 = vmatprep.subr.bf16.mxu1 %v1790_v0 }
 0x6cf   :  { %1516 = vmatpush3.bf16.msra.mxu0 %v1631_v4 }
 0x6d0   :  { %1517 = vmatprep.subr.bf16.mxu0 %v1790_v0 }
 0x6d1   :  { %1536 = vmatpush3.bf16.msra.mxu1 %v1639_v9 }
 0x6d2   :  { %1537 = vmatprep.subr.bf16.mxu1 %v1790_v0 }
 0x6d3   :  { %1518 = vmatpush3.bf16.msra.mxu0 %v1632_v6 }
 0x6d4   :  { %1519 = vmatprep.subr.bf16.mxu0 %v1790_v0 }
 0x6d5   :  { %1538 = vmatpush3.bf16.msra.mxu1 %v1640_v11 }
 0x6d6   :  { %1539 = vmatprep.subr.bf16.mxu1 %v1790_v0 }
 0x6d7   :  { %1520 = vmatpush3.bf16.msra.mxu0 %v1633_v8 }
 0x6d8   :  { %1521 = vmatprep.subr.bf16.mxu0 %v1790_v0 }
 0x6d9   :  { %1540 = vmatpush3.bf16.msra.mxu1 %v1641_v13 }
 0x6da   :  { %1541 = vmatprep.subr.bf16.mxu1 %v1790_v0 }
 0x6db   :  { %1522 = vmatpush3.bf16.msra.mxu0 %v1634_v10 }
 0x6dc   :  { %1523 = vmatprep.subr.bf16.mxu0 %v1790_v0 }
 0x6dd   :  { %1542 = vmatpush3.bf16.msra.mxu1 %v1642_v15 }
 0x6de   :  { %1543 = vmatprep.subr.bf16.mxu1 %v1790_v0 }
 0x6df   :  { %1524 = vmatpush3.bf16.msra.mxu0 %v1635_v12 }
 0x6e1   :  { %1544 = vmatpush3.bf16.msra.mxu1 %v1643_v16 }
 0x6e2   :  { %1526 = vmatmul.mubr.bf16.vlgmr.msra.gmra.mrb[0].mxu0 %v940_v14 }
 0x74a   :  { %v1175_v28 = vpop.permute.xlu0 %1174 }
 0x74b   :  { %vm1176_vm9 = vcmp.eq.s32.totalorder %v1175_v28, 1 }
 0x7b5   :  { %v1048_v21 = vpop.f32.mrb[0].mxu0 }
 0x7b6   :  { %v1049_v22 = vadd.f32 %v1269_v20, %v1048_v21  ;;  %v1527_v23 = vpop.f32.mrb[1].mxu0 }
 0x7b7   :  { %v1051_v24 = vpop.f32.mrb[2].mxu0 }
 0x7b8   :  { %v1054_v25 = vmax.f32 %v1049_v22, 0.0  ;;  %v1528_v26 = vpop.f32.mrb[3].mxu0 }
 0x7ba   :  { %v1055_v27 = vpack.c.bf16 %v1054_v25, %v1054_v25 }
 0x7bc   :  { %1546 = vmatmul.mubr.bf16.vlgmr.msra.gmra.mrb[0].mxu1 %v1055_v27 }
 0x88f   :  { %v1163_v30 = vpop.f32.mrb[0].mxu1 }
 0x890   :  { %v1164_v32 = vadd.f32 %v1279_v29, %v1163_v30  ;;  %v1547_v33 = vpop.f32.mrb[1].mxu1 }
 0x891   :  { %v1166_v34 = vpop.f32.mrb[2].mxu1 }
 0x892   :  { %v1177_v35 = vsel %vm1176_vm9, %v1164_v32, %v1171_v31  ;;  %v1548_v36 = vpop.f32.mrb[3].mxu1 }
 0x893   :  { %1178 = vst [vmem:[#allocation14] sm:$0xff] %v1177_v35 }
 0x894 PF:  { %s1793_s9 = smov [#allocation14]  }
 0x895   :  { %s1185_s10 = sshll.u32 %s1793_s9, 4  ;;  %s1186_s10 = int_to_ptr.vmem [resolvable:$true] %s1185_s10 }
 0x896   :  { %s1742_s2 = scalar_lea.vmem %s1186_s10, 128  ;;  %p1747_p12 = scmp.lt.s32.totalorder %s1186_s10, %s1186_s10 }
 0x897   :  { %p1743_p11 = scmp.ne.s32.totalorder %s1186_s10, %s1742_s2  ;;  %p1748_p13 = scmp.lt.s32.totalorder %s1742_s2, %s1742_s2 }
 0x899   :  { %p1749_p0 = por %p1748_p13, %p1747_p12 }
 0x89b   :  { %p1750_p1 = pnand %p1749_p0, %p1743_p11 }
 0x89d   :  { %1753 = shalt.err (!%p1750_p1)
}
 0x89e   :  { %s1754_s25 = scalar_lea.hbm %s2041_s12, 128 }
 0x89f   :  { %p1755_p2 = scmp.ne.s32.totalorder %s2041_s12, %s1754_s25  ;;  %p1758_p3 = scmp.lt.u32.totalorder %s1754_s25, %s2041_s12 }
 0x8a1   :  { %p1760_p4 = pnand %p1758_p3, %p1755_p2 }
 0x8a3   :  { %1763 = shalt.err (!%p1760_p4)
}
 0x8a4   :  { %1188 = dma.vmem_to_hbm [thread:$0]  %s1186_s10, 128, %s2041_s12, [#allocation8]  }
 0x8a5   :  { %1772 = dma.done.wait [#allocation8], 128  }
 0x8a6   :  { %1773 = vsyncadd [#allocation8], 4294967168 }
 0x8a7   :  { %1192 = vsyncpa [#allocation7], 1 }
 0x8a8   :  { %1193 = vsyncpa [#allocation10], 1 }
 0x8a9   :  { %1194 = vsyncpa [#allocation13], 1 }
 0x8aa   :  { %1195 = vsyncpa [#allocation8], 1 }

</bundles_post_ra>
